<compile_context>
chip_gen: v7x
topology: tpu7x:2x2x1
jax: 0.10.0
libtpu: 0.0.40
codegen_flags: <defaults>
</compile_context>

<pallas_src>
import functools

import jax
import jax.numpy as jnp
from jax.experimental import pallas as pl
from jax.experimental.pallas import tpu as pltpu


def _round_up(n, m):
    return ((n + m - 1) // m) * m


def _choose_batch_tile(B, batch_tile):
    """Batch tile: multiple of 8, >=2 grid steps once B > 8 (v7x megacore),
    capped at `batch_tile` (v6e HBM-roofline sweet spot)."""
    if B <= 8:
        return 8
    half = _round_up(-(-B // 2), 8)          # ceil(B/2) rounded up to sublanes
    return max(8, min(batch_tile, half))


def _hardswish(x):
    # PyTorch Hardswish: x * relu6(x + 3) / 6   (computed in f32)
    return x * jnp.clip(x + 3.0, 0.0, 6.0) * (1.0 / 6.0)


def densenet_kernel(x1_ref, w13_ref, w2b_ref, b_ref, out_ref, *, D):
    x1 = x1_ref[...]                                   # (TB, D)  f32
    x1_c = x1.astype(w13_ref.dtype)                    # bf16 MXU operand

    # Single MXU pass with N = 3D:
    #   t[:, :D]  = x1 @ W1.T          (dense1 pre-activation)
    #   t[:, D:]  = x1 @ W2.T[:D, :]   (x1-facing half of dense2)
    t = jnp.dot(x1_c, w13_ref[...], preferred_element_type=jnp.float32)
    t = t + b_ref[...]                                 # adds [b1 | b2] in f32

    h1 = _hardswish(t[:, :D])                          # (TB, D)  f32

    # dense2 split GEMM: x2 @ W2.T = x1 @ W2a + h1 @ W2b  (x2 never built)
    h2 = t[:, D:] + jnp.dot(h1.astype(w2b_ref.dtype), w2b_ref[...],
                            preferred_element_type=jnp.float32)
    h2 = _hardswish(h2)                                # (TB, 2D) f32

    # x3 = [x1 | h1 | h2]: one lane-dense 4*D-wide store (128 lanes at D=32).
    out_ref[...] = jnp.concatenate([x1, h1, h2], axis=1)


def prepare_densenet_params(w1, b1, w2, b2, *, compute_dtype=jnp.bfloat16):
    """One-time layout plumbing (call once, reuse every forward).

    nn.Linear convention in: w1 (D, D), w2 (2D, 2D) as (out, in); b1 (D,),
    b2 (2D,).  Returns (w13, w2b, b12) with
      w13 = [W1.T | W2.T[:D, :]]  (D, 3D)  compute_dtype
      w2b = W2.T[D:, :]           (D, 2D)  compute_dtype
      b12 = [b1 | b2]             (1, 3D)  f32
    """
    D = w1.shape[0]
    assert w1.shape == (D, D) and b1.shape == (D,)
    assert w2.shape == (2 * D, 2 * D) and b2.shape == (2 * D,)
    w2t = w2.T                                            # (2D, 2D) in -> out
    w13 = jnp.concatenate([w1.T, w2t[:D, :]], axis=1).astype(compute_dtype)
    w2b = w2t[D:, :].astype(compute_dtype)
    b12 = jnp.concatenate([b1, b2]).reshape(1, 3 * D).astype(jnp.float32)
    return w13, w2b, b12


def densenet_forward(x1, params, *, batch_tile=512):
    """Fused DenseNet forward.  `params` from prepare_densenet_params."""
    w13, w2b, b12 = params
    B, D = x1.shape
    assert w13.shape == (D, 3 * D)
    assert w2b.shape == (D, 2 * D)
    assert b12.shape == (1, 3 * D)

    tb = _choose_batch_tile(B, batch_tile)
    grid = (pl.cdiv(B, tb),)          # ragged last tile handled by Pallas

    kernel = functools.partial(densenet_kernel, D=D)

    return pl.pallas_call(
        kernel,
        out_shape=jax.ShapeDtypeStruct((B, 4 * D), jnp.float32),
        grid_spec=pltpu.PrefetchScalarGridSpec(
            num_scalar_prefetch=0,
            grid=grid,
            in_specs=[
                pl.BlockSpec((tb, D), lambda i: (i, 0)),         # x1 tile
                pl.BlockSpec((D, 3 * D), lambda i: (0, 0)),      # [W1.T|W2a] bf16
                pl.BlockSpec((D, 2 * D), lambda i: (0, 0)),      # W2b       bf16
                pl.BlockSpec((1, 3 * D), lambda i: (0, 0)),      # [b1|b2]   f32
            ],
            out_specs=pl.BlockSpec((tb, 4 * D), lambda i: (i, 0)),
        ),
        compiler_params=pltpu.CompilerParams(
            dimension_semantics=("parallel",),   # batch steps shard across TCs
            vmem_limit_bytes=32 * 1024 * 1024,
        ),
    )(x1, w13, w2b, b12)


def densenet_reference(x1, w1, b1, w2, b2):
    h1 = _hardswish(x1 @ w1.T + b1)
    x2 = jnp.concatenate([x1, h1], axis=1)
    h2 = _hardswish(x2 @ w2.T + b2)
    return jnp.concatenate([x2, h2], axis=1)


if __name__ == "__main__":
    lay_dim = 32
    batch = 19     # not a multiple of the tile: exercises the ragged last block
                   # and still yields a 2-step grid (tb=16) for megacore.

    key = jax.random.PRNGKey(0)
    kx, kw1, kb1, kw2, kb2 = jax.random.split(key, 5)

    x1 = jax.random.normal(kx, (batch, lay_dim), dtype=jnp.float32)

    # nn.Linear convention: weight (out, in), bias (out,)
    w1 = jax.random.normal(kw1, (lay_dim, lay_dim), dtype=jnp.float32) * 0.1
    b1 = jax.random.normal(kb1, (lay_dim,), dtype=jnp.float32) * 0.1
    w2 = jax.random.normal(kw2, (2 * lay_dim, 2 * lay_dim), dtype=jnp.float32) * 0.1
    b2 = jax.random.normal(kb2, (2 * lay_dim,), dtype=jnp.float32) * 0.1

    # One-time parameter preparation (hoisted out of the per-call path).
    params = prepare_densenet_params(w1, b1, w2, b2)

    out = densenet_forward(x1, params)
    out = jax.block_until_ready(out)

    ref = densenet_reference(x1, w1, b1, w2, b2)
    assert out.shape == (batch, 4 * lay_dim)
    # bf16 MXU operands with f32 accumulation -> loosened tolerance.
    max_err = float(jnp.max(jnp.abs(out - ref)))
    assert jnp.allclose(out, ref, atol=3e-2, rtol=3e-2), (
        f"mismatch vs reference, max abs err={max_err}")
    # x1 pass-through columns stay bit-exact (kept f32 end-to-end).
    assert jnp.array_equal(out[:, :lay_dim], x1)

    print("KERNEL_OK")
</pallas_src>

<mosaic_0001>
module attributes {stable_mosaic.version = 11 : i64} {
  func.func @densenet_kernel(%arg0: i32, %arg1: memref<16x32xf32, #tpu.memory_space<vmem>>, %arg2: memref<32x96xbf16, #tpu.memory_space<vmem>>, %arg3: memref<32x64xbf16, #tpu.memory_space<vmem>>, %arg4: memref<1x96xf32, #tpu.memory_space<vmem>>, %arg5: memref<16x128xf32, #tpu.memory_space<vmem>>) attributes {dimension_semantics = [#tpu.dimension_semantics<parallel>], iteration_bounds = array<i64: 2>, scalar_prefetch = 0 : i64, scratch_operands = 0 : i64, tpu.core_type = #tpu.core_type<tc>, window_params = [{transform_indices = @transform_0, window_bounds = array<i64: 16, 32>}, {pipeline_mode = #tpu.pipeline_mode<synchronous>, transform_indices = @transform_1, window_bounds = array<i64: 32, 96>}, {pipeline_mode = #tpu.pipeline_mode<synchronous>, transform_indices = @transform_2, window_bounds = array<i64: 32, 64>}, {pipeline_mode = #tpu.pipeline_mode<synchronous>, transform_indices = @transform_3, window_bounds = array<i64: 1, 96>}, {transform_indices = @transform_4, window_bounds = array<i64: 16, 128>}]} {
    %c0 = arith.constant 0 : index
    %c0_0 = arith.constant 0 : index
    %0 = vector.load %arg1[%c0, %c0_0] : memref<16x32xf32, #tpu.memory_space<vmem>>, vector<16x32xf32>
    %1 = arith.truncf %0 : vector<16x32xf32> to vector<16x32xbf16>
    %c0_1 = arith.constant 0 : index
    %c0_2 = arith.constant 0 : index
    %2 = vector.load %arg2[%c0_1, %c0_2] : memref<32x96xbf16, #tpu.memory_space<vmem>>, vector<32x96xbf16>
    %cst = arith.constant dense<0.000000e+00> : vector<16x96xf32>
    %3 = tpu.matmul %1, %2, %cst {dimension_numbers = #tpu.dot_dimension_numbers<[1], [0], [0], [1], [0, 0, 1, 1], [], []>} : vector<16x32xbf16>, vector<32x96xbf16>, vector<16x96xf32> -> vector<16x96xf32>
    %c0_3 = arith.constant 0 : index
    %c0_4 = arith.constant 0 : index
    %4 = vector.load %arg4[%c0_3, %c0_4] : memref<1x96xf32, #tpu.memory_space<vmem>>, vector<1x96xf32>
    %5 = vector.broadcast %4 : vector<1x96xf32> to vector<16x96xf32>
    %6 = arith.addf %3, %5 : vector<16x96xf32>
    %7 = vector.extract_strided_slice %6 {offsets = [0, 0], sizes = [16, 32], strides = [1, 1]} : vector<16x96xf32> to vector<16x32xf32>
    %cst_5 = arith.constant 3.000000e+00 : f32
    %8 = vector.broadcast %cst_5 : f32 to vector<16x32xf32>
    %9 = arith.addf %7, %8 : vector<16x32xf32>
    %cst_6 = arith.constant 0.000000e+00 : f32
    %cst_7 = arith.constant 6.000000e+00 : f32
    %10 = vector.broadcast %cst_6 : f32 to vector<16x32xf32>
    %11 = arith.maximumf %10, %9 : vector<16x32xf32>
    %12 = vector.broadcast %cst_7 : f32 to vector<16x32xf32>
    %13 = arith.minimumf %12, %11 : vector<16x32xf32>
    %14 = arith.mulf %7, %13 : vector<16x32xf32>
    %cst_8 = arith.constant 0.166666672 : f32
    %15 = vector.broadcast %cst_8 : f32 to vector<16x32xf32>
    %16 = arith.mulf %14, %15 : vector<16x32xf32>
    %17 = vector.extract_strided_slice %6 {offsets = [0, 32], sizes = [16, 64], strides = [1, 1]} : vector<16x96xf32> to vector<16x64xf32>
    %18 = arith.truncf %16 : vector<16x32xf32> to vector<16x32xbf16>
    %c0_9 = arith.constant 0 : index
    %c0_10 = arith.constant 0 : index
    %19 = vector.load %arg3[%c0_9, %c0_10] : memref<32x64xbf16, #tpu.memory_space<vmem>>, vector<32x64xbf16>
    %cst_11 = arith.constant dense<0.000000e+00> : vector<16x64xf32>
    %20 = tpu.matmul %18, %19, %cst_11 {dimension_numbers = #tpu.dot_dimension_numbers<[1], [0], [0], [1], [0, 0, 1, 1], [], []>} : vector<16x32xbf16>, vector<32x64xbf16>, vector<16x64xf32> -> vector<16x64xf32>
    %21 = arith.addf %17, %20 : vector<16x64xf32>
    %cst_12 = arith.constant 3.000000e+00 : f32
    %22 = vector.broadcast %cst_12 : f32 to vector<16x64xf32>
    %23 = arith.addf %21, %22 : vector<16x64xf32>
    %cst_13 = arith.constant 0.000000e+00 : f32
    %cst_14 = arith.constant 6.000000e+00 : f32
    %24 = vector.broadcast %cst_13 : f32 to vector<16x64xf32>
    %25 = arith.maximumf %24, %23 : vector<16x64xf32>
    %26 = vector.broadcast %cst_14 : f32 to vector<16x64xf32>
    %27 = arith.minimumf %26, %25 : vector<16x64xf32>
    %28 = arith.mulf %21, %27 : vector<16x64xf32>
    %cst_15 = arith.constant 0.166666672 : f32
    %29 = vector.broadcast %cst_15 : f32 to vector<16x64xf32>
    %30 = arith.mulf %28, %29 : vector<16x64xf32>
    %31 = tpu.concatenate %0, %16, %30 in 1 : vector<16x32xf32>, vector<16x32xf32>, vector<16x64xf32> -> vector<16x128xf32>
    %c0_16 = arith.constant 0 : index
    %c0_17 = arith.constant 0 : index
    %32 = vector.load %arg5[%c0_16, %c0_17] : memref<16x128xf32, #tpu.memory_space<vmem>>, vector<16x128xf32>
    tpu.vector_store %arg5[%c0_16, %c0_17], %31 {strides = array<i32>} : memref<16x128xf32, #tpu.memory_space<vmem>>, vector<16x128xf32>,
    return
  }
  func.func @transform_0(%arg0: i32) -> (i32, i32) {
    %c0_i32 = arith.constant 0 : i32
    %c0_i32_0 = arith.constant 0 : i32
    return %arg0, %c0_i32 : i32, i32
  }
  func.func @transform_1(%arg0: i32) -> (i32, i32) {
    %c0_i32 = arith.constant 0 : i32
    %c0_i32_0 = arith.constant 0 : i32
    %c0_i32_1 = arith.constant 0 : i32
    return %c0_i32, %c0_i32_0 : i32, i32
  }
  func.func @transform_2(%arg0: i32) -> (i32, i32) {
    %c0_i32 = arith.constant 0 : i32
    %c0_i32_0 = arith.constant 0 : i32
    %c0_i32_1 = arith.constant 0 : i32
    return %c0_i32, %c0_i32_0 : i32, i32
  }
  func.func @transform_3(%arg0: i32) -> (i32, i32) {
    %c0_i32 = arith.constant 0 : i32
    %c0_i32_0 = arith.constant 0 : i32
    %c0_i32_1 = arith.constant 0 : i32
    return %c0_i32, %c0_i32_0 : i32, i32
  }
  func.func @transform_4(%arg0: i32) -> (i32, i32) {
    %c0_i32 = arith.constant 0 : i32
    %c0_i32_0 = arith.constant 0 : i32
    return %arg0, %c0_i32 : i32, i32
  }
}

</mosaic_0001>

<bundles_post_ra>
// kernel: tpu_custom_call.1
= control target key start
LH: loop header
LB: loop body
LE: loop exit
PB: predicated region body
PF: predicated region fallthrough
CT: control target
= control target key end

     0   :  { %9 = vsyncpa [#allocation3], 0  ;;  %s1143_s0 = inlined_call_operand.hbm [shape: f32[19,32], index: 0, kind: input, shape index: {}]   ;;  %s1144_s1 = inlined_call_operand.hbm [shape: bf16[32,96], index: 1, kind: input, shape index: {}]   ;;  %s1145_s2 = inlined_call_operand.hbm [shape: bf16[32,64], index: 2, kind: input, shape index: {}]   ;;  %s1146_s3 = inlined_call_operand.vmem [shape: f32[1,96], index: 3, kind: input, shape index: {}]   ;;  %s1147_s4 = inlined_call_operand.hbm [shape: f32[19,128], index: 4, kind: output, shape index: {}]  }
   0x1   :  { %11 = vsyncpa [#allocation3 + $0x1], 0 }
   0x2   :  { %12 = vsyncpa [#allocation6], 0 }
   0x3   :  { %13 = vsyncpa [#allocation4], 0 }
   0x4   :  { %15 = vsyncpa [#allocation4 + $0x1], 0  ;;  %s883_s15 = smov 0   ;;  %s885_s16 = smov 0  }
   0x5   :  { %s887_s17 = smov 0   ;;  %s889_s18 = smov 0  }
   0x6 LB: > { %s904_s19 = sadd.s32 4294967295, %s843_s18   ;;  %s559_s20 = sadd.s32 4294967294, %s843_s18   ;;  %s843_s18 = sphi %s889_s18, %s1167_s18   ;;  %s839_s17 = sphi %s887_s17, %s1166_s17   ;;  %s835_s16 = sphi %s885_s16, %s1165_s16   ;;  %s831_s15 = sphi %s883_s15, %s1164_s15  }
   0x7   : > { %s908_s21 = sadd.s32 1, %s843_s18   ;;  %s28_s22 = sadd.s32 1, %s839_s17 }
   0x8   : > { %s25_s23 = ssub.s32 %s843_s18, %s908_s21  ;;  %p35_p0 = scmp.ne.s32.totalorder %s839_s17, %s835_s16 }
   0x9   : > { %p26_p1 = scmp.eq.s32.totalorder %s25_s23, 0  ;;  %p36_p2 = scmp.eq.s32.totalorder %s843_s18, 0 }
   0xa   : > { %p41_p3 = scmp.ne.s32.totalorder %s835_s16, %s831_s15  ;;  %p1148_p4 = scmp.eq.s32.totalorder %s904_s19, 0 }
   0xb   : > { %s920_s24 = scalar_select %p26_p1, %s839_s17, %s28_s22  }
   0xc   : > { %p922_p5 = por %p36_p2, %p35_p0  ;;  %p928_p6 = por %p1148_p4, %p41_p3 }
   0xd   : > { %p128_p7 = scmp.eq.s32.totalorder %s904_s19, 1  ;;  %p134_p8 = scmp.eq.s32.totalorder %s559_s20, 1 }
   0xe   : > { %s1151_s25 = scalar_select %p922_p5, 1, 0 }
   0xf   : > { %s1152_s26 = scalar_select %p928_p6, 1, 0 }
  0x10   : > { %p560_p9 = scmp.ge.s32.totalorder %s843_s18, 1  ;;  %p141_p10 = scmp.lt.s32.totalorder %s843_s18, 3 }
  0x11   : > { %p935_p11 = por %p128_p7, %p35_p0  ;;  %p939_p12 = por %p134_p8, %p41_p3 }
  0x12   : > { %p943_p13 = pnand %p560_p9, %p141_p10  ;;  %s845_s30 = smov [#allocation5]  }
  0x13   : > { %s1153_s27 = scalar_select %p935_p11, 1, 0 }
  0x14   : > { %s1154_s28 = scalar_select %p939_p12, 1, 0 }
  0x15   : > { %s1155_s29 = scalar_select %p943_p13, 1, 0 }
  0x16   : > { %p626_p1 = pneg %p943_p13  ;;  %s153_s5 = sshll.u32 %s845_s30, 4  ;;  %s154_s5 = int_to_ptr.vmem [resolvable:$true] %s153_s5 }
  0x17   : > { %s846_s7 = smov [#allocation7]   ;;  %s689_s11 = scalar_lea.hbm %s1144_s1, 256 }
  0x18   : > { %p951_p2 = pnand %p626_p1, %p1148_p4  ;;  %s166_s8 = sshll.u32 %s846_s7, 4  ;;  %s955_s8 = int_to_ptr.vmem [resolvable:$true] %s166_s8 }
  0x19   : > { %p690_p0 = scmp.ne.s32.totalorder %s1144_s1, %s689_s11  ;;  %p696_p9 = scmp.lt.u32.totalorder %s689_s11, %s1144_s1 }
  0x1a   : > { %p691_p3 = pneg %p951_p2 }
  0x1c   : > { %p692_p7 = pnand %p691_p3, %p690_p0 }
  0x1e   : > { %p693_p8 = pneg %p692_p7 }
  0x20   : > { %p698_p10 = pnand %p696_p9, %p693_p8 }
  0x22   : > { %701 = shalt.err (!%p698_p10)
}
  0x23   : > { %s702_s22 = scalar_lea.vmem %s154_s5, 256  ;;  %p710_p11 = scmp.lt.s32.totalorder %s154_s5, %s154_s5 }
  0x24   : > { %p703_p1 = scmp.ne.s32.totalorder %s154_s5, %s702_s22  ;;  %p711_p6 = scmp.lt.s32.totalorder %s702_s22, %s702_s22 }
  0x26   : > { %p705_p4 = pnand %p703_p1, %p691_p3  ;;  %p712_p13 = por %p711_p6, %p710_p11 }
  0x28   : > { %p706_p12 = pneg %p705_p4 }
  0x2a   : > { %p713_p5 = pnand %p712_p13, %p706_p12 }
  0x2c   : > { %716 = shalt.err (!%p713_p5)
}
  0x2d   : > { %s847_s23 = smov 64   ;;  %s848_s30 = smov 4  }
  0x2e   : > { %629 = dma.hbm_to_vmem [thread:$0]  (!%p951_p2), %s1144_s1, 256, %s154_s5, [#allocation6], %s847_s23, %s847_s23, %s848_s30  }
  0x2f   : > { %s717_s12 = scalar_lea.hbm %s1145_s2, 256 }
  0x30   : > { %p718_p4 = scmp.ne.s32.totalorder %s1145_s2, %s717_s12  ;;  %p724_p11 = scmp.lt.u32.totalorder %s717_s12, %s1145_s2 }
  0x32   : > { %p720_p5 = pnand %p718_p4, %p691_p3 }
  0x34   : > { %p721_p6 = pneg %p720_p5 }
  0x36   : > { %p726_p12 = pnand %p724_p11, %p721_p6 }
  0x38   : > { %729 = shalt.err (!%p726_p12)
}
  0x39   : > { %s730_s5 = scalar_lea.vmem %s955_s8, 256  ;;  %p738_p8 = scmp.lt.s32.totalorder %s955_s8, %s955_s8 }
  0x3a   : > { %p731_p13 = scmp.ne.s32.totalorder %s955_s8, %s730_s5  ;;  %p739_p9 = scmp.lt.s32.totalorder %s730_s5, %s730_s5 }
  0x3c   : > { %p733_p0 = pnand %p731_p13, %p691_p3  ;;  %p740_p10 = por %p739_p9, %p738_p8 }
  0x3e   : > { %p734_p7 = pneg %p733_p0 }
  0x40   : > { %p741_p1 = pnand %p740_p10, %p734_p7 }
  0x42   : > { %744 = shalt.err (!%p741_p1)
}
  0x43   : > { %632 = dma.hbm_to_vmem [thread:$0]  (!%p951_p2), %s1145_s2, 256, %s955_s8, [#allocation6], %s847_s23, %s847_s23, %s848_s30  }
  0x44   : > { %p563_p4 = scmp.ge.s32.totalorder %s843_s18, 2 }
  0x45   : > { %p1157_p3 = scmp.ne.s32.totalorder (!%p563_p4), %s1151_s25, 0 }
  0x46   : > { %179 = sbr.rel (%p563_p4) target bundleno = 112 (0x70), region = 28 }
  0x4d   : > { %182 = sbr.rel (!%p1157_p3) target bundleno = 112 (0x70), region = 32  ;;  %s183_s10 = sand.u32 (%p1157_p3), 1, %s839_s17  }
  0x4e   : > { %s565_s11 = sshll.u32 (%p1157_p3), %s843_s18, 1  ;;  %s564_s12 = sshll.u32 (%p1157_p3), %s183_s10, 4 }
  0x4f   : > { %s189_s13 = ssub.s32 (%p1157_p3), 3, %s565_s11  ;;  %s1014_s23 = scalar_lea.sflag (%p1157_p3), [#allocation3], %s183_s10 }
  0x50   : > { %p190_p5 = scmp.lt.s32.totalorder (%p1157_p3), %s189_s13, 2  ;;  %s187_s30 = scalar_lea.vmem (%p1157_p3), [#allocation2], %s564_s12 }
  0x54   : > { %s1169_s13 = smov (!%p190_p5, %s189_s13), 2 }
  0x55   : > { %s1011_s6 = sshll.u32 %s1169_s13, 7 }
  0x56   : > { %s194_s8 = ssub.s32 256, %s1011_s6 }
  0x57   : > { %195 = vsyncadd %s1014_s23, %s194_s8  ;;  %p567_p2 = scmp.ne.s32.totalorder %s1011_s6, 0  ;;  %s592_s25 = sshll.u32 %s843_s18, 8 }
  0x58   : > { %s1022_s22 = scalar_lea.hbm %s1143_s0, %s592_s25  ;;  %s200_s5 = sshll.u32 %s187_s30, 4  ;;  %s1024_s5 = int_to_ptr.vmem [resolvable:$true] %s200_s5 }
  0x59   : > { %s745_s7 = scalar_lea.hbm %s1022_s22, %s1011_s6  ;;  %s749_s11 = scalar_lea.hbm %s1143_s0, 384 }
  0x5a   : > { %p746_p6 = scmp.ne.s32.totalorder %s1022_s22, %s745_s7  ;;  %p750_p13 = scmp.lt.u32.totalorder %s1022_s22, %s1143_s0 }
  0x5b   : > { %p751_p0 = scmp.lt.u32.totalorder %s749_s11, %s745_s7  ;;  %p753_p8 = scmp.lt.u32.totalorder %s745_s7, %s1022_s22 }
  0x5c   : > { %p747_p11 = pnand %p746_p6, %p567_p2 }
  0x5d   : > { %p752_p7 = por %p751_p0, %p750_p13 }
  0x5e   : > { %p748_p12 = pneg %p747_p11 }
  0x5f   : > { %p754_p9 = por %p753_p8, %p752_p7 }
  0x61   : > { %p755_p10 = pnand %p754_p9, %p748_p12 }
  0x63   : > { %758 = shalt.err (!%p755_p10)
}
  0x64   : > { %s759_s8 = scalar_lea.vmem %s1024_s5, %s1011_s6  ;;  %s849_s30 = smov [#allocation2]  }
  0x65   : > { %p760_p1 = scmp.ne.s32.totalorder %s1024_s5, %s759_s8  ;;  %s763_s25 = sshll.u32 %s849_s30, 4  ;;  %s764_s25 = int_to_ptr.vmem [resolvable:$false] %s763_s25 }
  0x66   : > { %s765_s14 = scalar_lea.vmem %s764_s25, 512  ;;  %p766_p6 = scmp.lt.s32.totalorder %s1024_s5, %s764_s25 }
  0x67   : > { %p761_p3 = pnand %p760_p1, %p567_p2  ;;  %p767_p11 = scmp.lt.s32.totalorder %s765_s14, %s759_s8 }
  0x69   : > { %p762_p5 = pneg %p761_p3  ;;  %p768_p13 = por %p767_p11, %p766_p6 }
  0x6b   : > { %p769_p0 = pnand %p768_p13, %p762_p5 }
  0x6d   : > { %772 = shalt.err (!%p769_p0)
}
  0x6e   : > { %s850_s20 = smov 128   ;;  %s851_s7 = smov 8  }
  0x6f   : > { %206 = dma.hbm_to_vmem [thread:$0]  (%p567_p2), %s1022_s22, %s1011_s6, %s1024_s5, %s1014_s23, %s850_s20, %s850_s20, %s851_s7  }
  0x70 PF: > { %p1158_p12 = scmp.ne.s32.totalorder %s1155_s29, 0 }
  0x71   : > { %s1054_s9 = sand.u32 (!%p1158_p12), 1, %s835_s16   ;;  %p1159_p7 = scmp.ne.s32.totalorder (!%p1158_p12), %s1152_s26, 0 }
  0x72   : > { %212 = sbr.rel (%p1158_p12) target bundleno = 851 (0x353), region = 36  ;;  %s572_s10 = sshll.u32 (!%p1158_p12), %s1054_s9, 4 }
  0x73   : > { %s215_s11 = scalar_lea.sflag (!%p1158_p12), [#allocation3], %s1054_s9  ;;  %s218_s12 = scalar_lea.vmem (!%p1158_p12), [#allocation2], %s572_s10 }
  0x79   : > { %818 = dma.done.wait (%p1159_p7), %s215_s11, 256  }
  0x7a   : > { %820 = vsyncadd (%p1159_p7), %s215_s11, 4294967040  ;;  %p1160_p2 = scmp.eq.s32.totalorder %s904_s19, 0 }
  0x7c   : > { %822 = dma.done.wait (%p1160_p2), [#allocation6], 512   ;;  %p1161_p8 = pmov %p1160_p2 }
  0x7d   : > { %v852_v0 = vmov 0.0   ;;  %vm853_vm0 = vmmov 0   ;;  %v685_v1 = vld [vmem:[#allocation5] sm:$0xff]   ;;  %v686_v2 = vld [vmem:[#allocation5 + $0x8] sm:$0xff]   ;;  %vm288_vm1 = vcmask 261120   ;;  %v687_v6 = vld [vmem:[#allocation7] sm:$0xff]  }
  0x7e   : > { %824 = vsyncadd (%p1161_p8), [#allocation6], 4294966784  ;;  %600 = vmatprep.subr.bf16.mxu0 %v852_v0  ;;  %604 = vmatprep.mubr.msk.bf16.mxu0 %vm853_vm0, %v852_v0  ;;  %v262_v3 = vld [vmem:[%s218_s12] sm:$0xff]  ;;  %v1068_v4 = vld [vmem:[%s218_s12 + $0x8] sm:$0xff]  ;;  %s854_s6 = smov 32   ;;  %vm442_vm2 = vcmask 523264  }
  0x7f   : > { %608 = vmatprep.subr.bf16.mxu1 %v852_v0  ;;  %612 = vmatprep.mubr.msk.bf16.mxu1 %vm853_vm0, %v852_v0  ;;  %v264_v5 = vpack.c.bf16 %v1068_v4, %v262_v3  ;;  %v688_v7 = vld [vmem:[#allocation7 + $0x8] sm:$0xff]   ;;  %v576_v8 = vld [vmem:[%s1146_s3] ss:$0 sm:$0xff]  ;;  %s250_s23 = scalar_lea.vmem [#allocation8], %s572_s10  ;;  %s448_s22 = scalar_lea.sflag [#allocation4], %s1054_s9 }
  0x80   : > { %601 = vmatpush3.bf16.msra.mxu0 %v685_v1  ;;  %609 = vmatpush3.bf16.msra.mxu1 %v687_v6  ;;  %p1162_p9 = scmp.ne.s32.totalorder %s1153_s27, 0 }
  0x81   : > { %602 = vmatprep.subr.bf16.mxu0 %v852_v0  ;;  %610 = vmatprep.subr.bf16.mxu1 %v852_v0  ;;  %s584_s5 = sshll.u32 (%p1162_p9), %s904_s19, 1 }
  0x82   : > { %s456_s13 = ssub.s32 (%p1162_p9), 3, %s584_s5 }
  0x83   : > { %p457_p10 = scmp.lt.s32.totalorder (%p1162_p9), %s456_s13, 2 }
  0x84   : > { %603 = vmatpush3.bf16.msra.mxu0 %v686_v2  ;;  %611 = vmatpush3.bf16.msra.mxu1 %v688_v7 }
  0x87   : > { %605 = vmatmul.mubr.msk.bf16.vlgmr.msra.gmra.mrb[0].mxu0 %vm288_vm1, %v264_v5 }
 0x15a   : > { %v326_v9 = vpop.f32.mrb[0].mxu0 }
 0x15b   : > { %v327_v10 = vadd.f32 %v576_v8, %v326_v9  ;;  %v606_v11 = vpop.f32.mrb[1].mxu0 }
 0x15c   : > { %v329_v12 = vpop.f32.mrb[2].mxu0 }
 0x15d   : > { %v330_v13 = vadd.f32 %v576_v8, %v329_v12  ;;  %v607_v14 = vpop.f32.mrb[3].mxu0  ;;  %v333_v15 = vadd.f32 3.0, %v327_v10 }
 0x15f   : > { %v334_v16 = vadd.f32 3.0, %v330_v13  ;;  %v335_v17 = vmax.f32 %v333_v15, 0.0 }
 0x161   : > { %v336_v18 = vmax.f32 %v334_v16, 0.0  ;;  %v337_v19 = vmin.f32 %v335_v17, 6.0 }
 0x163   : > { %v338_v20 = vmin.f32 %v336_v18, 6.0  ;;  %v339_v21 = vmul.f32 %v337_v19, %v327_v10 }
 0x165   : > { %v340_v22 = vmul.f32 %v338_v20, %v330_v13  ;;  %v341_v23 = vmul.f32 0.16666667, %v339_v21 }
 0x167   : > { %426 = vrot.lane.b32.xlu1 %v341_v23, %s854_s6  ;;  %v342_v24 = vmul.f32 0.16666667, %v340_v22 }
 0x169   : > { %v343_v25 = vpack.c.bf16 %v342_v24, %v341_v23 }
 0x16b   : > { %428 = vrot.lane.b32.xlu1 %v342_v24, %s854_s6  ;;  %613 = vmatmul.mubr.msk.bf16.vlgmr.msra.gmra.mrb[0].mxu1 %vm288_vm1, %v343_v25 }
 0x1d9   : > { %v427_v44 = vpop.permute.xlu1 %426 }
 0x1da   : > { %v440_v45 = vsel %vm288_vm1, %v262_v3, %v427_v44 }
 0x1dd   : > { %v429_v46 = vpop.permute.xlu1 %428 }
 0x1de   : > { %v441_v49 = vsel %vm288_vm1, %v1068_v4, %v429_v46 }
 0x23e   : > { %v397_v26 = vpop.f32.mrb[0].mxu1 }
 0x23f   : > { %406 = vrot.lane.b32.xlu0 %v397_v26, %s854_s6  ;;  %v614_v27 = vpop.f32.mrb[1].mxu1 }
 0x240   : > { %v400_v28 = vpop.f32.mrb[2].mxu1 }
 0x241   : > { %v615_v29 = vpop.f32.mrb[3].mxu1 }
 0x243   : > { %408 = vrot.lane.b32.xlu0 %v400_v28, %s854_s6 }
 0x2b1   : > { %v407_v30 = vpop.permute.xlu0 %406 }
 0x2b2   : > { %v412_v31 = vadd.f32 %v407_v30, %v327_v10 }
 0x2b4   : > { %v414_v32 = vadd.f32 3.0, %v412_v31 }
 0x2b5   : > { %v409_v33 = vpop.permute.xlu0 %408 }
 0x2b6   : > { %v416_v34 = vmax.f32 %v414_v32, 0.0  ;;  %v413_v35 = vadd.f32 %v409_v33, %v330_v13 }
 0x2b8   : > { %v418_v36 = vmin.f32 %v416_v34, 6.0  ;;  %v415_v37 = vadd.f32 3.0, %v413_v35 }
 0x2ba   : > { %v420_v38 = vmul.f32 %v418_v36, %v412_v31  ;;  %v417_v39 = vmax.f32 %v415_v37, 0.0 }
 0x2bc   : > { %v422_v40 = vmul.f32 0.16666667, %v420_v38  ;;  %v419_v41 = vmin.f32 %v417_v39, 6.0 }
 0x2be   : > { %v421_v42 = vmul.f32 %v419_v41, %v413_v35  ;;  %434 = vrot.lane.b32.xlu0 %v422_v40, %s854_s6 }
 0x2c0   : > { %v423_v43 = vmul.f32 0.16666667, %v421_v42 }
 0x2c2   : > { %436 = vrot.lane.b32.xlu1 %v423_v43, %s854_s6 }
 0x330   : > { %v435_v47 = vpop.permute.xlu0 %434  ;;  %454 = sbr.rel (!%p1162_p9) target bundleno = 851 (0x353), region = 52 }
 0x331   : > { %v443_v48 = vsel %vm442_vm2, %v440_v45, %v435_v47 }
 0x332   : > { %445 = vst [vmem:[%s250_s23] sm:$0xff] %v443_v48 }
 0x334   : > { %v437_v50 = vpop.permute.xlu1 %436 }
 0x335   : > { %v444_v51 = vsel %vm442_vm2, %v441_v49, %v437_v50 }
 0x336   : > { %446 = vst [vmem:[%s250_s23 + $0x8] sm:$0xff] %v444_v51 }
 0x337   : > { %s1171_s13 = smov (!%p457_p10, %s456_s13), 2 }
 0x338   : > { %s1085_s8 = sshll.u32 %s1171_s13, 7 }
 0x339   : > { %s461_s30 = ssub.s32 256, %s1085_s8 }
 0x33a   : > { %462 = vsyncadd %s448_s22, %s461_s30  ;;  %p586_p1 = scmp.ne.s32.totalorder %s1085_s8, 0  ;;  %s593_s25 = sshll.u32 %s904_s19, 8 }
 0x33b   : > { %s1095_s20 = scalar_lea.hbm %s1147_s4, %s593_s25  ;;  %s467_s7 = sshll.u32 %s250_s23, 4  ;;  %s1097_s7 = int_to_ptr.vmem [resolvable:$true] %s467_s7 }
 0x33c   : > { %s773_s10 = scalar_lea.vmem %s1097_s7, %s1085_s8  ;;  %s855_s11 = smov [#allocation8]  }
 0x33d   : > { %p774_p3 = scmp.ne.s32.totalorder %s1097_s7, %s773_s10  ;;  %s777_s12 = sshll.u32 %s855_s11, 4  ;;  %s778_s12 = int_to_ptr.vmem [resolvable:$false] %s777_s12 }
 0x33e   : > { %s779_s19 = scalar_lea.vmem %s778_s12, 512  ;;  %p780_p11 = scmp.lt.s32.totalorder %s1097_s7, %s778_s12 }
 0x33f   : > { %p775_p5 = pnand %p774_p3, %p586_p1  ;;  %p781_p13 = scmp.lt.s32.totalorder %s779_s19, %s773_s10 }
 0x341   : > { %p776_p6 = pneg %p775_p5  ;;  %p782_p0 = por %p781_p13, %p780_p11 }
 0x343   : > { %p783_p12 = pnand %p782_p0, %p776_p6 }
 0x345   : > { %786 = shalt.err (!%p783_p12)
}
 0x346   : > { %s787_s26 = scalar_lea.hbm %s1095_s20, %s1085_s8  ;;  %s791_s23 = scalar_lea.hbm %s1147_s4, 384 }
 0x347   : > { %p788_p7 = scmp.ne.s32.totalorder %s1095_s20, %s787_s26  ;;  %p792_p9 = scmp.lt.u32.totalorder %s1095_s20, %s1147_s4 }
 0x348   : > { %p793_p10 = scmp.lt.u32.totalorder %s791_s23, %s787_s26  ;;  %p795_p5 = scmp.lt.u32.totalorder %s787_s26, %s1095_s20 }
 0x349   : > { %p789_p2 = pnand %p788_p7, %p586_p1 }
 0x34a   : > { %p794_p3 = por %p793_p10, %p792_p9 }
 0x34b   : > { %p790_p8 = pneg %p789_p2 }
 0x34c   : > { %p796_p6 = por %p795_p5, %p794_p3 }
 0x34e   : > { %p797_p11 = pnand %p796_p6, %p790_p8 }
 0x350   : > { %800 = shalt.err (!%p797_p11)
}
 0x351   : > { %s856_s30 = smov 128   ;;  %s857_s25 = smov 8  }
 0x352   : > { %473 = dma.vmem_to_hbm [thread:$0]  (%p586_p1), %s1097_s7, %s1085_s8, %s1095_s20, %s448_s22, %s856_s30, %s856_s30, %s857_s25  }
 0x353 PF: > { %s482_s27 = sand.u32 1, %s831_s15   ;;  %p1163_p13 = scmp.ne.s32.totalorder %s1154_s28, 0 }
 0x354   : > { %s483_s14 = scalar_lea.sflag [#allocation4], %s482_s27 }
 0x355   : > { %p634_p0 = pnand %p563_p4, %p1163_p13 }
 0x357   : > { %826 = dma.done.wait (!%p634_p0), %s483_s14, 256  }
 0x358   : > { %828 = vsyncadd (!%p634_p0), %s483_s14, 4294967040  ;;  %p18_p12 = scmp.ge.s32.totalorder %s908_s21, 4   ;;  %s1164_s15 = smov %s835_s16 }
 0x359   : > { %s1165_s16 = smov %s839_s17  ;;  %s1166_s17 = smov %s920_s24 }
 0x35a   : > { %s1167_s18 = smov %s908_s21  ;;  %20 = sbr.rel (!%p18_p12) target bundleno = 6 (0x6), region = 89 }
 0x361   :  { %488 = vsyncpa [#allocation3], 1 }
 0x362   :  { %490 = vsyncpa [#allocation3 + $0x1], 1 }
 0x363   :  { %491 = vsyncpa [#allocation6], 1 }
 0x364   :  { %492 = vsyncpa [#allocation4], 1 }
 0x365   :  { %494 = vsyncpa [#allocation4 + $0x1], 1 }

</bundles_post_ra>
